<compile_context>
chip_gen: v7x
topology: tpu7x:2x2x1
jax: 0.10.0
libtpu: 0.0.40
codegen_flags: <defaults>
</compile_context>

<pallas_src>
import functools

import jax
import jax.numpy as jnp
import numpy as np
from jax.experimental import pallas as pl
from jax.experimental.pallas import tpu as pltpu


# ----------------------------------------------------------------------------
# Hardware-aware sizing helpers
# ----------------------------------------------------------------------------
def _round_up(x, m):
    return ((x + m - 1) // m) * m


def _vmem_capacity_bytes():
    try:
        info = pltpu.get_tpu_info()
        cap = getattr(info, "vmem_capacity_bytes", None)
        if cap:
            return int(cap)
    except Exception:
        pass
    return 128 * 1024 * 1024  # v5e / v6e default


def _affine_budget():
    """(per-tile bytes for x, vmem_limit_bytes) sized per TPU generation."""
    cap = _vmem_capacity_bytes()
    if cap <= 64 * 1024 * 1024:
        # v7x: 64 MiB physical VMEM.  in + out tiles, double buffered ~= 4x tile.
        tile = 8 * 1024 * 1024
        limit = 44 * 1024 * 1024
    else:
        # v5e / v6e: 128 MiB physical.  Raise above v5e's 16 MiB scoped default.
        tile = 6 * 1024 * 1024
        limit = 40 * 1024 * 1024
    return tile, limit


def _bf16_compute_supported():
    """bf16-native VALU on v6e / v7x; keep f32 compute on v4/v5."""
    try:
        kind = jax.devices()[0].device_kind.lower()
        return not ("v4" in kind or "v5" in kind)
    except Exception:
        return True


_BF16_COMPUTE = _bf16_compute_supported()


# ----------------------------------------------------------------------------
# Kernels
# ----------------------------------------------------------------------------
def actnorm_affine_kernel(x_ref, scale_ref, bias_ref, out_ref):
    """out = x * scale + bias, with per-row (sublane-broadcast) scale/bias.

    forward: scale = exp(logs)+1e-8, bias = scale*loc
    reverse: scale = exp(-logs),     bias = -loc
    Compute dtype = scale dtype (f32, or bf16 on v6e/v7x bf16 inputs).
    """
    s = scale_ref[...]
    b = bias_ref[...]
    x = x_ref[...].astype(s.dtype)
    out_ref[...] = (x * s + b).astype(out_ref.dtype)


def actnorm_init_kernel(x_ref, sum_ref, sq_ref, *, n_total, hw_total, needs_mask):
    """Per-slice streaming per-channel stats.

    x_ref block: (nb, C, hwb); grid = (n_slices [parallel], hw_blocks [arbitrary]).
    Outputs are per-slice partial sums (accumulated in the resident output block
    across the hw axis); finalization happens in JAX (Chan combine).
    """
    i = pl.program_id(0)
    j = pl.program_id(1)
    nb, c, hwb = x_ref.shape

    @pl.when(j == 0)
    def _():
        sum_ref[...] = jnp.zeros_like(sum_ref)
        sq_ref[...] = jnp.zeros_like(sq_ref)

    x = x_ref[...].astype(jnp.float32)  # (nb, C, hwb)
    if needs_mask:
        n_idx = jax.lax.broadcasted_iota(jnp.int32, (nb, 1, hwb), 0) + i * nb
        hw_idx = jax.lax.broadcasted_iota(jnp.int32, (nb, 1, hwb), 2) + j * hwb
        valid = (n_idx < n_total) & (hw_idx < hw_total)
        x = jnp.where(valid, x, 0.0)

    sum_ref[...] += jnp.sum(x, axis=(0, 2)).reshape(1, c, 1)
    sq_ref[...] += jnp.sum(x * x, axis=(0, 2)).reshape(1, c, 1)


# ----------------------------------------------------------------------------
# Pallas wrappers
# ----------------------------------------------------------------------------
def _affine_pallas(x_rm, scale_rows, bias_rows):
    """x_rm: (R, M) = (N*C, H*W); scale/bias: (R, 1) in the compute dtype."""
    R, M = x_rm.shape
    itemsize = jnp.dtype(x_rm.dtype).itemsize
    tile_bytes, vmem_limit = _affine_budget()

    # Wide lanes first (unmasked stores), then as many rows as the budget allows.
    mb_cap = max(128, ((tile_bytes // (8 * itemsize)) // 128) * 128)
    mb = min(_round_up(M, 128), mb_cap)
    rb_target = max(8, ((tile_bytes // (mb * itemsize)) // 8) * 8)
    rb = min(_round_up(R, 8), rb_target)
    grid = (pl.cdiv(R, rb), pl.cdiv(M, mb))

    bytes_accessed = 2 * x_rm.size * itemsize + 4 * R * jnp.dtype(scale_rows.dtype).itemsize

    return pl.pallas_call(
        actnorm_affine_kernel,
        out_shape=jax.ShapeDtypeStruct((R, M), x_rm.dtype),
        grid_spec=pltpu.PrefetchScalarGridSpec(
            num_scalar_prefetch=0,
            grid=grid,
            in_specs=[
                pl.BlockSpec((rb, mb), lambda i, j: (i, j)),
                pl.BlockSpec((rb, 1), lambda i, j: (i, 0)),
                pl.BlockSpec((rb, 1), lambda i, j: (i, 0)),
            ],
            out_specs=pl.BlockSpec((rb, mb), lambda i, j: (i, j)),
        ),
        compiler_params=pltpu.CompilerParams(
            dimension_semantics=("parallel", "parallel"),
            vmem_limit_bytes=vmem_limit),
        cost_estimate=pl.CostEstimate(
            flops=2 * x_rm.size, transcendentals=0, bytes_accessed=bytes_accessed),
    )(x_rm, scale_rows, bias_rows)


def pallas_actnorm_init(x):
    """Data-dependent init: returns (loc, logs), each (C, 1) float32."""
    n, c, h, w = x.shape
    hw = h * w
    itemsize = jnp.dtype(x.dtype).itemsize
    x3 = x.reshape(n, c, hw)  # zero-cost reshape of NCHW

    # ~4 MiB blocks for the stats pass (double-buffered input = ~8 MiB VMEM).
    blk_bytes = 4 * 1024 * 1024
    hwb_cap = max(128, ((blk_bytes // (max(c, 1) * 8 * itemsize)) // 128) * 128)
    hwb = min(_round_up(hw, 128), hwb_cap)
    nb_budget = max(1, blk_bytes // (c * hwb * itemsize))
    # Keep >= 2 parallel slices when possible so both v7x TensorCores participate.
    n_slices = max(pl.cdiv(n, nb_budget), 2 if n >= 2 else 1)
    nb = min(n, pl.cdiv(n, n_slices))
    n_slices = pl.cdiv(n, nb)
    hw_blocks = pl.cdiv(hw, hwb)
    needs_mask = (n % nb != 0) or (hw % hwb != 0)

    _, vmem_limit = _affine_budget()

    psum, psq = pl.pallas_call(
        functools.partial(actnorm_init_kernel, n_total=n, hw_total=hw,
                          needs_mask=needs_mask),
        out_shape=(
            jax.ShapeDtypeStruct((n_slices, c, 1), jnp.float32),
            jax.ShapeDtypeStruct((n_slices, c, 1), jnp.float32),
        ),
        grid_spec=pltpu.PrefetchScalarGridSpec(
            num_scalar_prefetch=0,
            grid=(n_slices, hw_blocks),
            in_specs=[pl.BlockSpec((nb, c, hwb), lambda i, j: (i, 0, j))],
            out_specs=(
                pl.BlockSpec((1, c, 1), lambda i, j: (i, 0, 0)),
                pl.BlockSpec((1, c, 1), lambda i, j: (i, 0, 0)),
            ),
        ),
        compiler_params=pltpu.CompilerParams(
            dimension_semantics=("parallel", "arbitrary"),
            vmem_limit_bytes=vmem_limit),
        cost_estimate=pl.CostEstimate(
            flops=3 * x.size, transcendentals=0,
            bytes_accessed=x.size * itemsize + 8 * n_slices * c),
    )(x3)

    # Finalize in JAX: per-slice (mean, M2) combined with Chan's parallel formula.
    starts = jnp.arange(n_slices, dtype=jnp.float32) * nb
    valid_n = jnp.clip(float(n) - starts, 0.0, float(nb))
    cnt = (valid_n * hw)[:, None, None]                              # (S,1,1)
    mean_j = psum / jnp.maximum(cnt, 1.0)
    m2_j = jnp.maximum(psq - cnt * mean_j * mean_j, 0.0)
    total = jnp.sum(cnt, axis=0)                                     # (1,1)
    mean = jnp.sum(cnt * mean_j, axis=0) / total                     # (C,1)
    m2 = jnp.sum(m2_j, axis=0) + jnp.sum(cnt * (mean_j - mean) ** 2, axis=0)
    var = m2 / jnp.maximum(total - 1.0, 1.0)                         # unbiased (torch.std)
    std = jnp.sqrt(var)
    loc = -mean
    logs = jnp.log(1.0 / (std + 1e-6) + 1e-6)
    return loc, logs


def _compute_dtype(x):
    return jnp.bfloat16 if (x.dtype == jnp.bfloat16 and _BF16_COMPUTE) else jnp.float32


def pallas_actnorm_forward(x, loc_c, logs_c):
    """out = (exp(logs)+1e-8) * (x + loc);  logdet = H*W*sum(logs)."""
    n, c, h, w = x.shape
    cd = _compute_dtype(x)
    scale_c = jnp.exp(logs_c) + 1e-8            # (C,1), tiny, done in JAX
    bias2_c = scale_c * loc_c                   # fused: out = x*scale + scale*loc
    scale_rows = jnp.tile(scale_c, (n, 1)).astype(cd)   # (N*C, 1), row = n*C + c
    bias_rows = jnp.tile(bias2_c, (n, 1)).astype(cd)
    x_rm = x.reshape(n * c, h * w)              # zero-cost reshape of NCHW
    out_rm = _affine_pallas(x_rm, scale_rows, bias_rows)
    logdet = (h * w) * jnp.sum(logs_c)          # hoisted out of the kernel
    return out_rm.reshape(n, c, h, w), logdet


def pallas_actnorm_reverse(x, loc_c, logs_c):
    """out = x * exp(-logs) - loc."""
    n, c, h, w = x.shape
    cd = _compute_dtype(x)
    scale_rows = jnp.tile(jnp.exp(-logs_c), (n, 1)).astype(cd)
    bias_rows = jnp.tile(-loc_c, (n, 1)).astype(cd)
    x_rm = x.reshape(n * c, h * w)
    out_rm = _affine_pallas(x_rm, scale_rows, bias_rows)
    return out_rm.reshape(n, c, h, w)


def _first_call_forward(x):
    """First call (reverse=False): init + forward under a single jit."""
    loc_c, logs_c = pallas_actnorm_init(x)
    out, logdet = pallas_actnorm_forward(x, loc_c, logs_c)
    return loc_c, logs_c, out, logdet


_jit_init = jax.jit(pallas_actnorm_init)
_jit_first_fwd = jax.jit(_first_call_forward)
_jit_fwd = jax.jit(pallas_actnorm_forward)
_jit_rev = jax.jit(pallas_actnorm_reverse)


# ----------------------------------------------------------------------------
# Module-like wrapper mirroring the PyTorch ActNorm semantics
# ----------------------------------------------------------------------------
class ActNorm:
    def __init__(self, in_channel):
        self.loc = jnp.zeros((1, in_channel, 1, 1), jnp.float32)
        self.logs = jnp.ones((1, in_channel, 1, 1), jnp.float32)
        self.initialized = 0            # buffer 'initialized' (uint8 flag)
        self.in_channel = in_channel

    def __call__(self, x, reverse=False):
        c = self.in_channel
        if self.initialized == 0:
            if reverse:
                loc_c, logs_c = _jit_init(x)
                self.loc = loc_c.reshape(1, c, 1, 1)
                self.logs = logs_c.reshape(1, c, 1, 1)
                self.initialized = 1
                return _jit_rev(x, loc_c, logs_c)
            loc_c, logs_c, out, logdet = _jit_first_fwd(x)
            self.loc = loc_c.reshape(1, c, 1, 1)
            self.logs = logs_c.reshape(1, c, 1, 1)
            self.initialized = 1
            return out, logdet
        loc_c = self.loc.reshape(c, 1)
        logs_c = self.logs.reshape(c, 1)
        if reverse:
            return _jit_rev(x, loc_c, logs_c)
        return _jit_fwd(x, loc_c, logs_c)


# ----------------------------------------------------------------------------
# Pure-JAX reference (matches the PyTorch first-call forward exactly)
# ----------------------------------------------------------------------------
def ref_first_forward(x):
    n, c, h, w = x.shape
    flat = jnp.transpose(x, (1, 0, 2, 3)).reshape(c, -1)
    mean = flat.mean(axis=1)
    std = flat.std(axis=1, ddof=1)
    loc = -mean
    logs = jnp.log(1.0 / (std + 1e-6) + 1e-6)
    out = (jnp.exp(logs) + 1e-8)[None, :, None, None] * (x + loc[None, :, None, None])
    logdet = (h * w) * jnp.sum(logs)
    return out, logdet


if __name__ == "__main__":
    key = jax.random.PRNGKey(0)
    N, C, H, W = 2, 4, 16, 16
    x = jax.random.normal(key, (N, C, H, W), dtype=jnp.float32) * 1.7 + 0.3

    actnorm = ActNorm(C)
    out, logdet = actnorm(x, reverse=False)          # first call: data-dependent init
    out = jax.block_until_ready(out)
    logdet = jax.block_until_ready(logdet)

    # Exercise the reverse path once (round-trip is only approximate by design of
    # the source module: forward uses exp(logs)+1e-8, reverse uses exp(-logs)).
    x_rec = jax.block_until_ready(actnorm(out, reverse=True))

    ref_out, ref_logdet = ref_first_forward(x)
    np.testing.assert_allclose(np.asarray(out), np.asarray(ref_out), rtol=1e-5, atol=1e-5)
    np.testing.assert_allclose(float(logdet), float(ref_logdet), rtol=1e-4, atol=1e-3)
    np.testing.assert_allclose(np.asarray(x_rec), np.asarray(x), rtol=1e-4, atol=1e-4)

    print("KERNEL_OK")
</pallas_src>

<mosaic_0001>
module attributes {stable_mosaic.version = 11 : i64} {
  func.func @actnorm_init_kernel(%arg0: i32, %arg1: i32, %arg2: memref<1x4x256xf32, #tpu.memory_space<vmem>>, %arg3: memref<1x4x1xf32, #tpu.memory_space<vmem>>, %arg4: memref<1x4x1xf32, #tpu.memory_space<vmem>>) attributes {dimension_semantics = [#tpu.dimension_semantics<parallel>, #tpu.dimension_semantics<arbitrary>], iteration_bounds = array<i64: 2, 1>, scalar_prefetch = 0 : i64, scratch_operands = 0 : i64, tpu.core_type = #tpu.core_type<tc>, window_params = [{transform_indices = @transform_0, window_bounds = array<i64: 1, 4, 256>}, {transform_indices = @transform_1, window_bounds = array<i64: 1, 4, 1>}, {transform_indices = @transform_2, window_bounds = array<i64: 1, 4, 1>}]} {
    %c0_i32 = arith.constant 0 : i32
    %0 = arith.cmpi eq, %arg1, %c0_i32 : i32
    %1 = arith.extui %0 : i1 to i32
    %c0_i32_0 = arith.constant 0 : i32
    %2 = arith.cmpi ne, %1, %c0_i32_0 : i32
    scf.if %2 {
      %cst_16 = arith.constant 0.000000e+00 : f32
      %15 = vector.broadcast %cst_16 : f32 to vector<1x4x1xf32>
      %c0_17 = arith.constant 0 : index
      %c0_18 = arith.constant 0 : index
      %c0_19 = arith.constant 0 : index
      %16 = vector.load %arg3[%c0_17, %c0_18, %c0_19] : memref<1x4x1xf32, #tpu.memory_space<vmem>>, vector<1x4x1xf32>
      tpu.vector_store %arg3[%c0_17, %c0_18, %c0_19], %15 {strides = array<i32>} : memref<1x4x1xf32, #tpu.memory_space<vmem>>, vector<1x4x1xf32>,
      %cst_20 = arith.constant 0.000000e+00 : f32
      %17 = vector.broadcast %cst_20 : f32 to vector<1x4x1xf32>
      %c0_21 = arith.constant 0 : index
      %c0_22 = arith.constant 0 : index
      %c0_23 = arith.constant 0 : index
      %18 = vector.load %arg4[%c0_21, %c0_22, %c0_23] : memref<1x4x1xf32, #tpu.memory_space<vmem>>, vector<1x4x1xf32>
      tpu.vector_store %arg4[%c0_21, %c0_22, %c0_23], %17 {strides = array<i32>} : memref<1x4x1xf32, #tpu.memory_space<vmem>>, vector<1x4x1xf32>,
    } else {
    }
    %c0 = arith.constant 0 : index
    %c0_1 = arith.constant 0 : index
    %c0_2 = arith.constant 0 : index
    %3 = vector.load %arg2[%c0, %c0_1, %c0_2] : memref<1x4x256xf32, #tpu.memory_space<vmem>>, vector<1x4x256xf32>
    %c0_3 = arith.constant 0 : index
    %c0_4 = arith.constant 0 : index
    %c0_5 = arith.constant 0 : index
    %4 = vector.load %arg3[%c0_3, %c0_4, %c0_5] : memref<1x4x1xf32, #tpu.memory_space<vmem>>, vector<1x4x1xf32>
    %cst = arith.constant dense<0.000000e+00> : vector<4xf32>
    %5 = vector.multi_reduction <add>, %3, %cst [0, 2] : vector<1x4x256xf32> to vector<4xf32>
    %6 = vector.shape_cast %5 : vector<4xf32> to vector<1x4x1xf32>
    %7 = arith.addf %4, %6 : vector<1x4x1xf32>
    %c0_6 = arith.constant 0 : index
    %c0_7 = arith.constant 0 : index
    %c0_8 = arith.constant 0 : index
    %8 = vector.load %arg3[%c0_6, %c0_7, %c0_8] : memref<1x4x1xf32, #tpu.memory_space<vmem>>, vector<1x4x1xf32>
    tpu.vector_store %arg3[%c0_6, %c0_7, %c0_8], %7 {strides = array<i32>} : memref<1x4x1xf32, #tpu.memory_space<vmem>>, vector<1x4x1xf32>,
    %c0_9 = arith.constant 0 : index
    %c0_10 = arith.constant 0 : index
    %c0_11 = arith.constant 0 : index
    %9 = vector.load %arg4[%c0_9, %c0_10, %c0_11] : memref<1x4x1xf32, #tpu.memory_space<vmem>>, vector<1x4x1xf32>
    %10 = arith.mulf %3, %3 : vector<1x4x256xf32>
    %cst_12 = arith.constant dense<0.000000e+00> : vector<4xf32>
    %11 = vector.multi_reduction <add>, %10, %cst_12 [0, 2] : vector<1x4x256xf32> to vector<4xf32>
    %12 = vector.shape_cast %11 : vector<4xf32> to vector<1x4x1xf32>
    %13 = arith.addf %9, %12 : vector<1x4x1xf32>
    %c0_13 = arith.constant 0 : index
    %c0_14 = arith.constant 0 : index
    %c0_15 = arith.constant 0 : index
    %14 = vector.load %arg4[%c0_13, %c0_14, %c0_15] : memref<1x4x1xf32, #tpu.memory_space<vmem>>, vector<1x4x1xf32>
    tpu.vector_store %arg4[%c0_13, %c0_14, %c0_15], %13 {strides = array<i32>} : memref<1x4x1xf32, #tpu.memory_space<vmem>>, vector<1x4x1xf32>,
    return
  }
  func.func @transform_0(%arg0: i32, %arg1: i32) -> (i32, i32, i32) {
    %c0_i32 = arith.constant 0 : i32
    %c0_i32_0 = arith.constant 0 : i32
    return %arg0, %c0_i32, %arg1 : i32, i32, i32
  }
  func.func @transform_1(%arg0: i32, %arg1: i32) -> (i32, i32, i32) {
    %c0_i32 = arith.constant 0 : i32
    %c0_i32_0 = arith.constant 0 : i32
    %c0_i32_1 = arith.constant 0 : i32
    return %arg0, %c0_i32, %c0_i32_0 : i32, i32, i32
  }
  func.func @transform_2(%arg0: i32, %arg1: i32) -> (i32, i32, i32) {
    %c0_i32 = arith.constant 0 : i32
    %c0_i32_0 = arith.constant 0 : i32
    %c0_i32_1 = arith.constant 0 : i32
    return %arg0, %c0_i32, %c0_i32_0 : i32, i32, i32
  }
}

module attributes {stable_mosaic.version = 11 : i64} {
  func.func @actnorm_affine_kernel(%arg0: i32, %arg1: i32, %arg2: memref<8x256xf32, #tpu.memory_space<vmem>>, %arg3: memref<8x1xf32, #tpu.memory_space<vmem>>, %arg4: memref<8x1xf32, #tpu.memory_space<vmem>>, %arg5: memref<8x256xf32, #tpu.memory_space<vmem>>) attributes {dimension_semantics = [#tpu.dimension_semantics<parallel>, #tpu.dimension_semantics<parallel>], iteration_bounds = array<i64: 1, 1>, scalar_prefetch = 0 : i64, scratch_operands = 0 : i64, tpu.core_type = #tpu.core_type<tc>, window_params = [{transform_indices = @transform_0, window_bounds = array<i64: 8, 256>}, {transform_indices = @transform_1, window_bounds = array<i64: 8, 1>}, {transform_indices = @transform_2, window_bounds = array<i64: 8, 1>}, {transform_indices = @transform_3, window_bounds = array<i64: 8, 256>}]} {
    %c0 = arith.constant 0 : index
    %c0_0 = arith.constant 0 : index
    %0 = vector.load %arg3[%c0, %c0_0] : memref<8x1xf32, #tpu.memory_space<vmem>>, vector<8x1xf32>
    %c0_1 = arith.constant 0 : index
    %c0_2 = arith.constant 0 : index
    %1 = vector.load %arg4[%c0_1, %c0_2] : memref<8x1xf32, #tpu.memory_space<vmem>>, vector<8x1xf32>
    %c0_3 = arith.constant 0 : index
    %c0_4 = arith.constant 0 : index
    %2 = vector.load %arg2[%c0_3, %c0_4] : memref<8x256xf32, #tpu.memory_space<vmem>>, vector<8x256xf32>
    %3 = vector.broadcast %0 : vector<8x1xf32> to vector<8x256xf32>
    %4 = arith.mulf %2, %3 : vector<8x256xf32>
    %5 = vector.broadcast %1 : vector<8x1xf32> to vector<8x256xf32>
    %6 = arith.addf %4, %5 : vector<8x256xf32>
    %c0_5 = arith.constant 0 : index
    %c0_6 = arith.constant 0 : index
    %7 = vector.load %arg5[%c0_5, %c0_6] : memref<8x256xf32, #tpu.memory_space<vmem>>, vector<8x256xf32>
    tpu.vector_store %arg5[%c0_5, %c0_6], %6 {strides = array<i32>} : memref<8x256xf32, #tpu.memory_space<vmem>>, vector<8x256xf32>,
    return
  }
  func.func @transform_0(%arg0: i32, %arg1: i32) -> (i32, i32) {
    %c0_i32 = arith.constant 0 : i32
    return %arg0, %arg1 : i32, i32
  }
  func.func @transform_1(%arg0: i32, %arg1: i32) -> (i32, i32) {
    %c0_i32 = arith.constant 0 : i32
    %c0_i32_0 = arith.constant 0 : i32
    return %arg0, %c0_i32 : i32, i32
  }
  func.func @transform_2(%arg0: i32, %arg1: i32) -> (i32, i32) {
    %c0_i32 = arith.constant 0 : i32
    %c0_i32_0 = arith.constant 0 : i32
    return %arg0, %c0_i32 : i32, i32
  }
  func.func @transform_3(%arg0: i32, %arg1: i32) -> (i32, i32) {
    %c0_i32 = arith.constant 0 : i32
    return %arg0, %arg1 : i32, i32
  }
}

</mosaic_0001>

<bundles_post_ra>
// kernel: _first_call_forward.2
= control target key start
LH: loop header
LB: loop body
LE: loop exit
PB: predicated region body
PF: predicated region fallthrough
CT: control target
= control target key end

     0   :  { %s390_s9 = smov 0   ;;  %s392_s10 = smov 0   ;;  %s430_s0 = inlined_call_operand.vmem [shape: f32[2,4,256], index: 0, kind: input, shape index: {}]   ;;  %s431_s1 = inlined_call_operand.vmem [shape: f32[2,4,1], index: 1, kind: output, shape index: {0}]   ;;  %s432_s2 = inlined_call_operand.vmem [shape: f32[2,4,1], index: 2, kind: output, shape index: {1}]  }
   0x1   :  { %s394_s11 = smov 0  }
   0x2 LB: > { %s25_s12 = sadd.s32 1, %s368_s10  ;;  %p316_p0 = scmp.ge.s32.totalorder %s372_s11, 1  ;;  %s372_s11 = sphi %s394_s11, %s13_s11   ;;  %s368_s10 = sphi %s392_s10, %s434_s10   ;;  %s364_s9 = sphi %s390_s9, %s433_s9  }
   0x3   : > { %p27_p1 = scmp.ge.s32.totalorder %s25_s12, 2  ;;  %p134_p2 = scmp.lt.s32.totalorder %s372_s11, 3 }
   0x5   : > { %s436_s12 = smov (%p27_p1, %s25_s12), 0  ;;  %p135_p3 = pnand %p316_p0, %p134_p2 }
   0x6   : > { %p164_p4 = scmp.lt.s32.totalorder (!%p135_p3), %s364_s9, 1  ;;  %vm185_vm0 = vcmask (!%p135_p3), 3072   ;;  %vm193_vm1 = vcmask (!%p135_p3), 1043456   ;;  %v374_v1 = vmov (!%p135_p3), 0.0  }
   0x7   : > { %138 = sbr.rel (%p135_p3) target bundleno = 172 (0xac), region = 24 }
   0xe   : > { %s438_s9 = smov (!%p164_p4, %s364_s9), 1 }
   0xf   : > { %s323_s13 = sshll.u32 %s438_s9, 3  ;;  %s319_s14 = sshll.u32 %s438_s9, 2 }
  0x10   : > { %s171_s17 = scalar_lea.vmem %s430_s0, %s323_s13  ;;  %s176_s20 = scalar_lea.vmem %s431_s1, %s319_s14 }
  0x11   : > { %v188_v0 = vld [vmem:[%s171_s17] sm:$0xff]  ;;  %186 = vst.msk [vmem:[%s176_s20] sm:$0xf] %vm185_vm0, %v374_v1  ;;  %s180_s23 = scalar_lea.vmem %s432_s2, %s319_s14 }
  0x12   : > { %v191_v2 = vcombine.high %v188_v0, %v188_v0  ;;  %v194_v3 = vsel %vm193_vm1, %v188_v0, 0.0  ;;  %v203_v4 = vmul.f32 %v188_v0, %v188_v0  ;;  %187 = vst.msk [vmem:[%s180_s23] sm:$0xf] %vm185_vm0, %v374_v1 }
  0x14   : > { %v195_v5 = vsel %vm193_vm1, %v191_v2, 0.0  ;;  %v205_v6 = vcombine.high %v203_v4, %v203_v4  ;;  %v207_v7 = vsel %vm193_vm1, %v203_v4, 0.0 }
  0x15   : > { %v196_v8 = vadd.f32 %v195_v5, %v194_v3 }
  0x16   : > { %v208_v9 = vsel %vm193_vm1, %v205_v6, 0.0 }
  0x17   : > { %197 = vadd.xlane.f32.xlu0 %v196_v8  ;;  %v209_v10 = vadd.f32 %v208_v9, %v207_v7 }
  0x18   : > { %v189_v11 = vld [vmem:[%s176_s20] sm:$0xf] }
  0x19   : > { %v202_v14 = vld [vmem:[%s180_s23] sm:$0xf] }
  0x1b   : > { %210 = vadd.xlane.f32.xlu0 %v209_v10 }
  0xa4   : > { %v198_v12 = vpop.xlane.xlu0 %197 }
  0xa5   : > { %v199_v13 = vadd.f32 %v198_v12, %v189_v11 }
  0xa7   : > { %201 = vst.msk [vmem:[%s176_s20] sm:$0xf] %vm185_vm0, %v199_v13 }
  0xa8   : > { %v211_v15 = vpop.xlane.xlu0 %210 }
  0xa9   : > { %v212_v16 = vadd.f32 %v211_v15, %v202_v14 }
  0xab   : > { %213 = vst.msk [vmem:[%s180_s23] sm:$0xf] %vm185_vm0, %v212_v16 }
  0xac PF: > { %s13_s11 = sadd.s32 1, %s372_s11   ;;  %s433_s9 = smov %s368_s10 }
  0xad   : > { %p10_p5 = scmp.ge.s32.totalorder %s13_s11, 4   ;;  %s434_s10 = smov %s436_s12 }
  0xaf   :  { %12 = sbr.rel (!%p10_p5) target bundleno = 2 (0x2), region = 70 }

// kernel: _first_call_forward.3
= control target key start
LH: loop header
LB: loop body
LE: loop exit
PB: predicated region body
PF: predicated region fallthrough
CT: control target
= control target key end

     0   :  { %v40_v0 = vmov 0   ;;  %s79_s1 = inlined_call_operand.vmem [shape: f32[8,1], index: 1, kind: input, shape index: {}]   ;;  %s80_s2 = inlined_call_operand.vmem [shape: f32[8,1], index: 2, kind: input, shape index: {}]   ;;  %s81_s0 = inlined_call_operand.vmem [shape: f32[8,256], index: 0, kind: input, shape index: {}]   ;;  %s82_s3 = inlined_call_operand.vmem [shape: f32[8,256], index: 3, kind: output, shape index: {}]  }
   0x1   :  { %39 = vset.pattern.permute.xlu0 %v40_v0  ;;  %v14_v1 = vld [vmem:[%s79_s1] sm:$0xff]  ;;  %v17_v5 = vld [vmem:[%s81_s0 + $0x8] sm:$0xff] }
   0x2   :  { %20 = vperm.xlu0 %39, %v14_v1   ;;  %v15_v2 = vld [vmem:[%s80_s2] sm:$0xff] }
   0x3   :  { %v16_v4 = vld [vmem:[%s81_s0] sm:$0xff] }
   0x6   :  { %27 = vperm.xlu0 %39, %v15_v2  }
  0x81   :  { %v21_v3 = vpop.permute.xlu0 %20 }
  0x82   :  { %v23_v6 = vmul.f32 %v21_v3, %v16_v4  ;;  %v24_v7 = vmul.f32 %v21_v3, %v17_v5 }
  0x85   :  { %v28_v8 = vpop.permute.xlu0 %27 }
  0x86   :  { %v30_v9 = vadd.f32 %v28_v8, %v23_v6  ;;  %v31_v10 = vadd.f32 %v28_v8, %v24_v7 }
  0x88   :  { %32 = vst [vmem:[%s82_s3] sm:$0xff] %v30_v9  ;;  %33 = vst [vmem:[%s82_s3 + $0x8] sm:$0xff] %v31_v10 }

</bundles_post_ra>
